<compile_context>
chip_gen: v6e
topology: v6e:2x2x1
jax: 0.10.0
libtpu: 0.0.40
codegen_flags: <defaults>
</compile_context>

<pallas_src>
import functools

import jax
import jax.numpy as jnp
from jax.experimental import pallas as pl
from jax.experimental.pallas import tpu as pltpu


def _round_up(x, m):
    return ((x + m - 1) // m) * m


def _vmem_capacity_bytes():
    try:
        return int(pltpu.get_tpu_info().vmem_capacity_bytes)
    except Exception:
        return 64 << 20  # conservative fallback (v7x per-TC VMEM)


# --------------------------- Path A: resident weight ---------------------------
def _sublayer_kernel(x_ref, w_ref, wb_ref, gamma_ref, beta_ref, o_ref,
                     *, hidden: int, eps: float):
    x = x_ref[...].astype(jnp.float32)

    # LayerNorm (torch semantics), two-pass for numerical safety.
    mean = jnp.sum(x, axis=-1, keepdims=True) * (1.0 / hidden)
    diff = x - mean
    var = jnp.sum(diff * diff, axis=-1, keepdims=True) * (1.0 / (hidden - 1))
    inv = pl.reciprocal(jnp.sqrt(var) + eps, approx=True)   # EUP slot
    normed = (diff * (inv * gamma_ref[...]) + beta_ref[...]).astype(jnp.bfloat16)

    # Dense sublayer on the MXU: bf16 in, f32 accumulate.
    y = jnp.dot(normed, w_ref[...], preferred_element_type=jnp.float32)
    y = y + wb_ref[...]

    # Dropout = identity (inference) + residual.
    o_ref[...] = (x + y).astype(o_ref.dtype)


# ----------------- Path B: N-tiled weight (large H / v7x VMEM) -----------------
def _sublayer_nt_kernel(x_ref, w_ref, wb_ref, gamma_ref, beta_ref, o_ref,
                        normed_ref, *, hidden: int, eps: float, tn: int):
    j = pl.program_id(1)

    @pl.when(j == 0)
    def _():
        x = x_ref[...].astype(jnp.float32)
        mean = jnp.sum(x, axis=-1, keepdims=True) * (1.0 / hidden)
        diff = x - mean
        var = jnp.sum(diff * diff, axis=-1, keepdims=True) * (1.0 / (hidden - 1))
        inv = pl.reciprocal(jnp.sqrt(var) + eps, approx=True)
        normed_ref[...] = (diff * (inv * gamma_ref[...])
                           + beta_ref[...]).astype(jnp.bfloat16)

    y = jnp.dot(normed_ref[...], w_ref[...],
                preferred_element_type=jnp.float32) + wb_ref[...]
    col = pl.multiple_of(j * tn, tn)
    x_slab = x_ref[:, pl.ds(col, tn)].astype(jnp.float32)
    o_ref[...] = (x_slab + y).astype(o_ref.dtype)


def sublayer_connection(x, w, wb, gamma, beta, *, eps=1e-6, tile_rows=None,
                        n_tile=None, donate_x=False):
    """out = x + Dense(LayerNorm(x)); x: [B,S,H], w: [H,H], wb/gamma/beta: [H]."""
    B, S, H = x.shape
    rows = B * S
    itemsize = jnp.dtype(x.dtype).itemsize

    vmem_cap = _vmem_capacity_bytes()
    budget = vmem_cap - (4 << 20)            # headroom for Mosaic internals

    # Only a sublane-quantum pad (<= 7 rows); the grid itself is ragged (pl.cdiv),
    # so there is no tile-sized host pad + slice round-trip through HBM.
    rows_p = _round_up(rows, 8)
    x2 = x.reshape(rows, H)
    if rows_p != rows:
        x2 = jnp.pad(x2, ((0, rows_p - rows), (0, 0)))

    w_bf16 = w.astype(jnp.bfloat16)           # MXU-native; halves resident bytes
    wb2 = wb.reshape(1, H).astype(jnp.float32)
    gamma2 = gamma.reshape(1, H).astype(jnp.float32)
    beta2 = beta.reshape(1, H).astype(jnp.float32)

    small_params = 4 * H * 4
    weight_bytes = H * H * 2                  # bf16, single-buffered
    use_n_tile = (n_tile is not None) or (weight_bytes > budget // 2)

    def pick_tm(per_row_bytes, fixed_bytes):
        cands = sorted({1024, 512, 256, 128, 64, 32, 16, 8, min(rows_p, 1024)},
                       reverse=True)
        for tm in cands:
            if tm > rows_p or tm % 8 != 0:
                continue
            if tm * per_row_bytes + fixed_bytes <= budget:
                return tm
        return 8

    alias = {0: 0} if donate_x else {}

    if not use_n_tile:
        # ---------------- Path A: full bf16 weight resident ----------------
        per_row = 4 * H * itemsize            # 2 x-tile bufs + 2 out-tile bufs
        tm = tile_rows if tile_rows is not None else pick_tm(
            per_row, weight_bytes + small_params)
        tm = max(8, min(_round_up(tm, 8), rows_p))
        grid = (pl.cdiv(rows_p, tm),)

        need = tm * per_row + weight_bytes + small_params + (1 << 20)
        vmem_limit = int(min(max(need + need // 4, 32 << 20),
                             vmem_cap - (2 << 20)))

        cost = pl.CostEstimate(
            flops=2 * rows_p * H * H + 8 * rows_p * H,
            transcendentals=2 * rows_p,
            bytes_accessed=2 * rows_p * H * itemsize + weight_bytes + 3 * H * 4)

        def const(shape):                     # constant-index -> single buffer
            return pl.BlockSpec(shape, lambda i: (0, 0),
                                pipeline_mode=pl.Buffered(1))

        out = pl.pallas_call(
            functools.partial(_sublayer_kernel, hidden=H, eps=eps),
            out_shape=jax.ShapeDtypeStruct((rows_p, H), x.dtype),
            grid_spec=pltpu.PrefetchScalarGridSpec(
                num_scalar_prefetch=0,
                grid=grid,
                in_specs=[
                    pl.BlockSpec((tm, H), lambda i: (i, 0)),   # x tile (streamed)
                    const((H, H)),                             # weight (resident)
                    const((1, H)),                             # sublayer bias
                    const((1, H)),                             # LN gamma
                    const((1, H)),                             # LN beta
                ],
                out_specs=pl.BlockSpec((tm, H), lambda i: (i, 0)),
            ),
            compiler_params=pltpu.CompilerParams(
                dimension_semantics=("parallel",),
                vmem_limit_bytes=vmem_limit),
            cost_estimate=cost,
            input_output_aliases=alias,
        )(x2, w_bf16, wb2, gamma2, beta2)
    else:
        # ------------- Path B: weight slab-tiled along N (v7x / big H) -------------
        if n_tile is not None:
            tn = int(n_tile)
        else:
            tn = next((t for t in (512, 256, 128) if H % t == 0), H)
        assert H % tn == 0, "N-tile must divide H"

        per_row = 2 * H * itemsize + 2 * H + 2 * tn * itemsize
        fixed = 2 * H * tn * 2 + small_params + 2 * tn * 4
        tm = tile_rows if tile_rows is not None else pick_tm(per_row, fixed)
        tm = max(8, min(_round_up(tm, 8), rows_p))
        grid = (pl.cdiv(rows_p, tm), H // tn)

        need = tm * per_row + fixed + (1 << 20)
        vmem_limit = int(min(max(need + need // 4, 32 << 20),
                             vmem_cap - (2 << 20)))

        cost = pl.CostEstimate(
            flops=2 * rows_p * H * H + 8 * rows_p * H,
            transcendentals=2 * rows_p,
            bytes_accessed=(2 * rows_p * H * itemsize
                            + grid[0] * H * H * 2 + 3 * H * 4))

        def const2(shape):
            return pl.BlockSpec(shape, lambda i, j: (0, 0),
                                pipeline_mode=pl.Buffered(1))

        out = pl.pallas_call(
            functools.partial(_sublayer_nt_kernel, hidden=H, eps=eps, tn=tn),
            out_shape=jax.ShapeDtypeStruct((rows_p, H), x.dtype),
            grid_spec=pltpu.PrefetchScalarGridSpec(
                num_scalar_prefetch=0,
                grid=grid,
                in_specs=[
                    pl.BlockSpec((tm, H), lambda i, j: (i, 0)),  # x (held across j)
                    pl.BlockSpec((H, tn), lambda i, j: (0, j)),  # weight slab
                    pl.BlockSpec((1, tn), lambda i, j: (0, j)),  # bias slab
                    const2((1, H)),                              # LN gamma
                    const2((1, H)),                              # LN beta
                ],
                out_specs=pl.BlockSpec((tm, tn), lambda i, j: (i, j)),
                scratch_shapes=[pltpu.VMEM((tm, H), jnp.bfloat16)],  # normed(x)
            ),
            compiler_params=pltpu.CompilerParams(
                dimension_semantics=("parallel", "arbitrary"),
                vmem_limit_bytes=vmem_limit),
            cost_estimate=cost,
            input_output_aliases=alias,
        )(x2, w_bf16, wb2, gamma2, beta2)

    if rows_p != rows:
        out = out[:rows]
    return out.reshape(B, S, H)


def _reference(x, w, wb, gamma, beta, eps=1e-6):
    xf = x.astype(jnp.float32)
    mean = jnp.mean(xf, axis=-1, keepdims=True)
    diff = xf - mean
    var = jnp.sum(diff * diff, axis=-1, keepdims=True) / (x.shape[-1] - 1)
    std = jnp.sqrt(var)
    normed = gamma * diff / (std + eps) + beta
    y = normed @ w + wb
    return (xf + y).astype(x.dtype)


if __name__ == "__main__":
    key = jax.random.PRNGKey(0)
    kx, kw, kg, kb, kx2, kx3, kw3, kg3, kb3 = jax.random.split(key, 9)

    # ---- Case 1: small module-consistent shape (batch=2, seq=8, hidden=32). ----
    B, S, H = 2, 8, 32
    x = jax.random.normal(kx, (B, S, H), dtype=jnp.float32)
    gamma = 1.0 + 0.1 * jax.random.normal(kg, (H,), dtype=jnp.float32)   # a_2
    beta = 0.05 * jax.random.normal(kb, (H,), dtype=jnp.float32)         # b_2
    w = jax.random.normal(kw, (H, H), dtype=jnp.float32) / jnp.sqrt(H)
    wb = 0.01 * jnp.arange(H, dtype=jnp.float32)

    out = jax.block_until_ready(sublayer_connection(x, w, wb, gamma, beta))
    ref = _reference(x, w, wb, gamma, beta)
    assert jnp.allclose(out, ref, atol=5e-2, rtol=5e-2), "mismatch (case 1)"

    # ---- Case 2: rows not a multiple of 8 (sublane pad + ragged grid path). ----
    B2, S2 = 3, 5
    xb = jax.random.normal(kx2, (B2, S2, H), dtype=jnp.float32)
    out2 = jax.block_until_ready(sublayer_connection(xb, w, wb, gamma, beta))
    ref2 = _reference(xb, w, wb, gamma, beta)
    assert jnp.allclose(out2, ref2, atol=5e-2, rtol=5e-2), "mismatch (case 2)"

    # ---- Case 3: forced N-tiled weight path (the large-H / v7x path). ----
    H3 = 256
    x3 = jax.random.normal(kx3, (2, 8, H3), dtype=jnp.float32)
    gamma3 = 1.0 + 0.1 * jax.random.normal(kg3, (H3,), dtype=jnp.float32)
    beta3 = 0.05 * jax.random.normal(kb3, (H3,), dtype=jnp.float32)
    w3 = jax.random.normal(kw3, (H3, H3), dtype=jnp.float32) / jnp.sqrt(H3)
    wb3 = 0.01 * jnp.arange(H3, dtype=jnp.float32)

    out3 = jax.block_until_ready(
        sublayer_connection(x3, w3, wb3, gamma3, beta3, n_tile=128))
    ref3 = _reference(x3, w3, wb3, gamma3, beta3)
    assert jnp.allclose(out3, ref3, atol=5e-2, rtol=5e-2), "mismatch (case 3)"

    print("KERNEL_OK")
</pallas_src>

<mosaic_0001>
module attributes {stable_mosaic.version = 11 : i64} {
  func.func @_sublayer_kernel(%arg0: i32, %arg1: memref<16x32xf32, #tpu.memory_space<vmem>>, %arg2: memref<32x32xbf16, #tpu.memory_space<vmem>>, %arg3: memref<1x32xf32, #tpu.memory_space<vmem>>, %arg4: memref<1x32xf32, #tpu.memory_space<vmem>>, %arg5: memref<1x32xf32, #tpu.memory_space<vmem>>, %arg6: memref<16x32xf32, #tpu.memory_space<vmem>>) attributes {dimension_semantics = [#tpu.dimension_semantics<parallel>], iteration_bounds = array<i64: 1>, scalar_prefetch = 0 : i64, scratch_operands = 0 : i64, tpu.core_type = #tpu.core_type<tc>, window_params = [{transform_indices = @transform_0, window_bounds = array<i64: 16, 32>}, {pipeline_mode = #tpu.pipeline_mode<synchronous>, transform_indices = @transform_1, window_bounds = array<i64: 32, 32>}, {pipeline_mode = #tpu.pipeline_mode<synchronous>, transform_indices = @transform_2, window_bounds = array<i64: 1, 32>}, {pipeline_mode = #tpu.pipeline_mode<synchronous>, transform_indices = @transform_3, window_bounds = array<i64: 1, 32>}, {pipeline_mode = #tpu.pipeline_mode<synchronous>, transform_indices = @transform_4, window_bounds = array<i64: 1, 32>}, {transform_indices = @transform_5, window_bounds = array<i64: 16, 32>}]} {
    %c0 = arith.constant 0 : index
    %c0_0 = arith.constant 0 : index
    %0 = vector.load %arg1[%c0, %c0_0] : memref<16x32xf32, #tpu.memory_space<vmem>>, vector<16x32xf32>
    %cst = arith.constant dense<0.000000e+00> : vector<16xf32>
    %1 = vector.multi_reduction <add>, %0, %cst [1] : vector<16x32xf32> to vector<16xf32>
    %2 = vector.shape_cast %1 : vector<16xf32> to vector<16x1xf32>
    %cst_1 = arith.constant 3.125000e-02 : f32
    %3 = vector.broadcast %cst_1 : f32 to vector<16x1xf32>
    %4 = arith.mulf %2, %3 : vector<16x1xf32>
    %5 = vector.broadcast %4 : vector<16x1xf32> to vector<16x32xf32>
    %6 = arith.subf %0, %5 : vector<16x32xf32>
    %7 = arith.mulf %6, %6 : vector<16x32xf32>
    %cst_2 = arith.constant dense<0.000000e+00> : vector<16xf32>
    %8 = vector.multi_reduction <add>, %7, %cst_2 [1] : vector<16x32xf32> to vector<16xf32>
    %9 = vector.shape_cast %8 : vector<16xf32> to vector<16x1xf32>
    %cst_3 = arith.constant 0.0322580636 : f32
    %10 = vector.broadcast %cst_3 : f32 to vector<16x1xf32>
    %11 = arith.mulf %9, %10 : vector<16x1xf32>
    %12 = math.sqrt %11 : vector<16x1xf32>
    %cst_4 = arith.constant 9.99999997E-7 : f32
    %13 = vector.broadcast %cst_4 : f32 to vector<16x1xf32>
    %14 = arith.addf %12, %13 : vector<16x1xf32>
    %15 = tpu.reciprocal %14 {approx = true} : vector<16x1xf32> -> vector<16x1xf32>
    %c0_5 = arith.constant 0 : index
    %c0_6 = arith.constant 0 : index
    %16 = vector.load %arg4[%c0_5, %c0_6] : memref<1x32xf32, #tpu.memory_space<vmem>>, vector<1x32xf32>
    %17 = vector.broadcast %15 : vector<16x1xf32> to vector<16x32xf32>
    %18 = vector.broadcast %16 : vector<1x32xf32> to vector<16x32xf32>
    %19 = arith.mulf %17, %18 : vector<16x32xf32>
    %20 = arith.mulf %6, %19 : vector<16x32xf32>
    %c0_7 = arith.constant 0 : index
    %c0_8 = arith.constant 0 : index
    %21 = vector.load %arg5[%c0_7, %c0_8] : memref<1x32xf32, #tpu.memory_space<vmem>>, vector<1x32xf32>
    %22 = vector.broadcast %21 : vector<1x32xf32> to vector<16x32xf32>
    %23 = arith.addf %20, %22 : vector<16x32xf32>
    %24 = arith.truncf %23 : vector<16x32xf32> to vector<16x32xbf16>
    %c0_9 = arith.constant 0 : index
    %c0_10 = arith.constant 0 : index
    %25 = vector.load %arg2[%c0_9, %c0_10] : memref<32x32xbf16, #tpu.memory_space<vmem>>, vector<32x32xbf16>
    %cst_11 = arith.constant dense<0.000000e+00> : vector<16x32xf32>
    %26 = tpu.matmul %24, %25, %cst_11 {dimension_numbers = #tpu.dot_dimension_numbers<[1], [0], [0], [1], [0, 0, 1, 1], [], []>} : vector<16x32xbf16>, vector<32x32xbf16>, vector<16x32xf32> -> vector<16x32xf32>
    %c0_12 = arith.constant 0 : index
    %c0_13 = arith.constant 0 : index
    %27 = vector.load %arg3[%c0_12, %c0_13] : memref<1x32xf32, #tpu.memory_space<vmem>>, vector<1x32xf32>
    %28 = vector.broadcast %27 : vector<1x32xf32> to vector<16x32xf32>
    %29 = arith.addf %26, %28 : vector<16x32xf32>
    %30 = arith.addf %0, %29 : vector<16x32xf32>
    %c0_14 = arith.constant 0 : index
    %c0_15 = arith.constant 0 : index
    %31 = vector.load %arg6[%c0_14, %c0_15] : memref<16x32xf32, #tpu.memory_space<vmem>>, vector<16x32xf32>
    tpu.vector_store %arg6[%c0_14, %c0_15], %30 {strides = array<i32>} : memref<16x32xf32, #tpu.memory_space<vmem>>, vector<16x32xf32>,
    return
  }
  func.func @transform_0(%arg0: i32) -> (i32, i32) {
    %c0_i32 = arith.constant 0 : i32
    %c0_i32_0 = arith.constant 0 : i32
    return %arg0, %c0_i32 : i32, i32
  }
  func.func @transform_1(%arg0: i32) -> (i32, i32) {
    %c0_i32 = arith.constant 0 : i32
    %c0_i32_0 = arith.constant 0 : i32
    %c0_i32_1 = arith.constant 0 : i32
    return %c0_i32, %c0_i32_0 : i32, i32
  }
  func.func @transform_2(%arg0: i32) -> (i32, i32) {
    %c0_i32 = arith.constant 0 : i32
    %c0_i32_0 = arith.constant 0 : i32
    %c0_i32_1 = arith.constant 0 : i32
    return %c0_i32, %c0_i32_0 : i32, i32
  }
  func.func @transform_3(%arg0: i32) -> (i32, i32) {
    %c0_i32 = arith.constant 0 : i32
    %c0_i32_0 = arith.constant 0 : i32
    %c0_i32_1 = arith.constant 0 : i32
    return %c0_i32, %c0_i32_0 : i32, i32
  }
  func.func @transform_4(%arg0: i32) -> (i32, i32) {
    %c0_i32 = arith.constant 0 : i32
    %c0_i32_0 = arith.constant 0 : i32
    %c0_i32_1 = arith.constant 0 : i32
    return %c0_i32, %c0_i32_0 : i32, i32
  }
  func.func @transform_5(%arg0: i32) -> (i32, i32) {
    %c0_i32 = arith.constant 0 : i32
    %c0_i32_0 = arith.constant 0 : i32
    return %arg0, %c0_i32 : i32, i32
  }
}

</mosaic_0001>

<bundles_post_ra>
// kernel: tpu_custom_call.1
= control target key start
LH: loop header
LB: loop body
LE: loop exit
PB: predicated region body
PF: predicated region fallthrough
CT: control target
= control target key end

     0   :  { %10 = vsyncpa [#allocation3], 0  ;;  %s383_s0 = inlined_call_operand.hbm [shape: f32[16,32], index: 0, kind: input, shape index: {}]   ;;  %s384_s1 = inlined_call_operand.hbm [shape: bf16[32,32], index: 1, kind: input, shape index: {}]   ;;  %s385_s2 = inlined_call_operand.vmem [shape: f32[1,32], index: 2, kind: input, shape index: {}]   ;;  %s386_s3 = inlined_call_operand.vmem [shape: f32[1,32], index: 3, kind: input, shape index: {}]   ;;  %s387_s4 = inlined_call_operand.vmem [shape: f32[1,32], index: 4, kind: input, shape index: {}]   ;;  %s388_s5 = inlined_call_operand.hbm [shape: f32[16,32], index: 5, kind: output, shape index: {}]  }
   0x1   :  { %11 = vsyncpa [#allocation6], 0 }
   0x2   :  { %12 = vsyncpa [#allocation4], 0  ;;  %s303_s18 = smov [#allocation2]  }
   0x3   :  { %s18_s19 = sshll.u32 %s303_s18, 4  ;;  %s19_s19 = int_to_ptr.vmem [resolvable:$true] %s18_s19 }
   0x4   :  { %s245_s20 = scalar_lea.vmem %s19_s19, 256  ;;  %p250_p1 = scmp.lt.s32.totalorder %s19_s19, %s19_s19 }
   0x5   :  { %p246_p0 = scmp.ne.s32.totalorder %s19_s19, %s245_s20  ;;  %p251_p2 = scmp.lt.s32.totalorder %s245_s20, %s245_s20 }
   0x7   :  { %p252_p3 = por %p251_p2, %p250_p1 }
   0x9   :  { %p253_p4 = pnand %p252_p3, %p246_p0 }
   0xb   :  { %256 = shalt.err (!%p253_p4)
}
   0xc   :  { %s304_s21 = smov 128   ;;  %s305_s22 = smov 8  }
   0xd   :  { %24 = dma.hbm_to_vmem [thread:$0]  %s383_s0, 256, %s19_s19, [#allocation3], %s304_s21, %s304_s21, %s305_s22  }
   0xe   :  { %s306_s25 = smov [#allocation5]  }
   0xf   :  { %s30_s26 = sshll.u32 %s306_s25, 4  ;;  %s31_s26 = int_to_ptr.vmem [resolvable:$true] %s30_s26 }
  0x10   :  { %s265_s27 = scalar_lea.vmem %s31_s26, 256  ;;  %p270_p6 = scmp.lt.s32.totalorder %s31_s26, %s31_s26 }
  0x11   :  { %p266_p5 = scmp.ne.s32.totalorder %s31_s26, %s265_s27  ;;  %p271_p7 = scmp.lt.s32.totalorder %s265_s27, %s265_s27 }
  0x13   :  { %p272_p8 = por %p271_p7, %p270_p6 }
  0x15   :  { %p273_p9 = pnand %p272_p8, %p266_p5 }
  0x17   :  { %276 = shalt.err (!%p273_p9)
}
  0x18   :  { %s307_s28 = smov 64   ;;  %s308_s29 = smov 4  }
  0x19   :  { %36 = dma.hbm_to_vmem [thread:$0]  %s384_s1, 256, %s31_s26, [#allocation6], %s307_s28, %s307_s28, %s308_s29  }
  0x1a   :  { %297 = dma.done.wait [#allocation3], 256  }
  0x1b   :  { %298 = vsyncadd [#allocation3], 4294967040 }
  0x1c   :  { %299 = dma.done.wait [#allocation6], 256  }
  0x1d   :  { %300 = vsyncadd [#allocation6], 4294967040  ;;  %vm52_vm0 = vcmask 261120   ;;  %v351_v0 = vld [vmem:[#allocation2] sm:$0xff]  ;;  %v353_v1 = vld [vmem:[#allocation2 + $0x8] sm:$0xff]  ;;  %v309_v15 = vmov 0.0  }
  0x1e   :  { %v53_v2 = vsel %vm52_vm0, %v351_v0, 0.0  ;;  %v56_v3 = vsel %vm52_vm0, %v353_v1, 0.0  ;;  %v227_v14 = vld [vmem:[#allocation5 + $0x8] sm:$0xff]   ;;  %210 = vmatprep.subr.bf16.mxu0 %v309_v15  ;;  %vm310_vm1 = vmmov 0   ;;  %v228_v16 = vld [vmem:[#allocation5] sm:$0xff]  }
  0x1f   :  { %54 = vadd.xlane.f32.xlu0 %v53_v2  ;;  %214 = vmatprep.mubr.msk.bf16.mxu0 %vm310_vm1, %v309_v15  ;;  %v201_v33 = vld [vmem:[%s386_s3] ss:$0 sm:$0xff]  ;;  %s311_s3 = smov [#allocation7]  }
  0x20   :  { %211 = vmatpush3.bf16.msra.mxu0 %v227_v14  ;;  %v202_v39 = vld [vmem:[%s387_s4] ss:$0 sm:$0xff]  ;;  %s188_s11 = sshll.u32 %s311_s3, 4  ;;  %s189_s11 = int_to_ptr.vmem [resolvable:$true] %s188_s11 }
  0x21   :  { %212 = vmatprep.subr.bf16.mxu0 %v309_v15  ;;  %v203_v44 = vld [vmem:[%s385_s2] ss:$0 sm:$0xff]  ;;  %s277_s4 = scalar_lea.vmem %s189_s11, 256  ;;  %p282_p11 = scmp.lt.s32.totalorder %s189_s11, %s189_s11 }
  0x22   :  { %p278_p10 = scmp.ne.s32.totalorder %s189_s11, %s277_s4  ;;  %p283_p12 = scmp.lt.s32.totalorder %s277_s4, %s277_s4 }
  0x23   :  { %57 = vadd.xlane.f32.xlu0 %v56_v3 }
  0x24   :  { %213 = vmatpush3.bf16.msra.mxu0 %v228_v16  ;;  %p284_p13 = por %p283_p12, %p282_p11 }
  0x26   :  { %p285_p0 = pnand %p284_p13, %p278_p10 }
  0xa8   :  { %v55_v4 = vpop.xlane.xlu0 %54 }
  0xa9   :  { %v59_v5 = vmul.f32 0.03125, %v55_v4 }
  0xab   :  { %v61_v6 = vsub.f32 %v351_v0, %v59_v5 }
  0xac   :  { %v58_v7 = vpop.xlane.xlu0 %57 }
  0xad   :  { %v60_v8 = vmul.f32 0.03125, %v58_v7  ;;  %v63_v9 = vmul.f32 %v61_v6, %v61_v6 }
  0xaf   :  { %v62_v10 = vsub.f32 %v353_v1, %v60_v8  ;;  %v65_v11 = vsel %vm52_vm0, %v63_v9, 0.0 }
  0xb0   :  { %66 = vadd.xlane.f32.xlu1 %v65_v11 }
  0xb1   :  { %v64_v12 = vmul.f32 %v62_v10, %v62_v10 }
  0xb3   :  { %v68_v13 = vsel %vm52_vm0, %v64_v12, 0.0 }
  0xb4   :  { %69 = vadd.xlane.f32.xlu1 %v68_v13 }
 0x139   :  { %v67_v17 = vpop.xlane.xlu1 %66 }
 0x13a   :  { %v71_v18 = vmul.f32 0.032258064, %v67_v17 }
 0x13c   :  { %229 = vrsqrt.f32 %v71_v18  ;;  %vm75_vm2 = vcmp.eq.f32.partialorder %v71_v18, inf  ;;  %v78_v23 = vand.u32 2147483648, %v71_v18  ;;  %vm77_vm3 = vcmp.eq.f32.partialorder %v71_v18, 0.0 }
 0x13d   :  { %v70_v19 = vpop.xlane.xlu1 %69 }
 0x13e   :  { %v72_v20 = vmul.f32 0.032258064, %v70_v19 }
 0x140   :  { %231 = vrsqrt.f32 %v72_v20  ;;  %vm82_vm4 = vcmp.eq.f32.partialorder %v72_v20, inf  ;;  %v85_v29 = vand.u32 2147483648, %v72_v20  ;;  %vm84_vm5 = vcmp.eq.f32.partialorder %v72_v20, 0.0 }
 0x149   :  { %v230_v21 = vpop.eup %229 }
 0x14a   :  { %v74_v22 = vmul.f32 %v230_v21, %v71_v18 }
 0x14c   :  { %v76_v24 = vsel %vm75_vm2, %v71_v18, %v74_v22 }
 0x14d   :  { %v232_v25 = vpop.eup %231  ;;  %v79_v26 = vsel %vm77_vm3, %v78_v23, %v76_v24 }
 0x14e   :  { %v87_v27 = vadd.f32 1e-06, %v79_v26  ;;  %v81_v28 = vmul.f32 %v232_v25, %v72_v20 }
 0x150   :  { %233 = vrcp.f32 %v87_v27  ;;  %v83_v30 = vsel %vm82_vm4, %v72_v20, %v81_v28 }
 0x151   :  { %v86_v31 = vsel %vm84_vm5, %v85_v29, %v83_v30 }
 0x152   :  { %v88_v32 = vadd.f32 1e-06, %v86_v31 }
 0x154   :  { %235 = vrcp.f32 %v88_v32 }
 0x15d   :  { %v234_v34 = vpop.eup %233 }
 0x15e   :  { %v98_v35 = vmul.f32 %v234_v34, %v201_v33 }
 0x160   :  { %v100_v38 = vmul.f32 %v98_v35, %v61_v6 }
 0x161   :  { %v236_v36 = vpop.eup %235 }
 0x162   :  { %v99_v37 = vmul.f32 %v236_v36, %v201_v33  ;;  %v109_v41 = vadd.f32 %v202_v39, %v100_v38 }
 0x164   :  { %v101_v40 = vmul.f32 %v99_v37, %v62_v10 }
 0x166   :  { %v110_v42 = vadd.f32 %v202_v39, %v101_v40 }
 0x168   :  { %v111_v43 = vpack.c.bf16 %v110_v42, %v109_v41 }
 0x16a   :  { %215 = vmatmul.mubr.msk.bf16.vlgmr.msra.gmra.mxu0 %vm52_vm0, %v111_v43 }
 0x22a   :  { %v172_v45 = vpop.f32.mrf.mxu0 }
 0x22b   :  { %v173_v46 = vadd.f32 %v203_v44, %v172_v45 }
 0x22c   :  { %v216_v47 = vpop.f32.mrf.mxu0 }
 0x22d   :  { %v179_v48 = vadd.f32 %v173_v46, %v351_v0 }
 0x22e   :  { %v175_v49 = vpop.f32.mrf.mxu0 }
 0x22f   :  { %181 = vst.msk [vmem:[#allocation7] sm:$0xff] %vm52_vm0, %v179_v48  ;;  %v176_v50 = vadd.f32 %v203_v44, %v175_v49 }
 0x230   :  { %v217_v51 = vpop.f32.mrf.mxu0 }
 0x231   :  { %v180_v52 = vadd.f32 %v176_v50, %v353_v1 }
 0x233   :  { %182 = vst.msk [vmem:[#allocation7 + $0x8] sm:$0xff] %vm52_vm0, %v180_v52 }
 0x234   :  { %288 = shalt.err (!%p285_p0)
}
 0x235   :  { %194 = dma.vmem_to_hbm [thread:$0]  %s189_s11, 256, %s388_s5, [#allocation4], %s304_s21, %s304_s21, %s305_s22  }
 0x236   :  { %301 = dma.done.wait [#allocation4], 256  }
 0x237   :  { %302 = vsyncadd [#allocation4], 4294967040 }
 0x238   :  { %198 = vsyncpa [#allocation3], 1 }
 0x239   :  { %199 = vsyncpa [#allocation6], 1 }
 0x23a   :  { %200 = vsyncpa [#allocation4], 1 }

</bundles_post_ra>
